<compile_context>
chip_gen: v7x
topology: tpu7x:2x2x1
jax: 0.10.0
libtpu: 0.0.40
codegen_flags: <defaults>
</compile_context>

<pallas_src>
import functools

import jax
import jax.numpy as jnp
import numpy as np
from jax.experimental import pallas as pl
from jax.experimental.pallas import tpu as pltpu


# ---------------------------------------------------------------------------
# Generation-aware VMEM budget + tiling helpers
# ---------------------------------------------------------------------------
@functools.lru_cache(maxsize=1)
def _vmem_config():
    """Returns (live-block budget bytes, vmem_limit_bytes or None)."""
    try:
        cap = int(pltpu.get_tpu_info().vmem_capacity_bytes)
        # v5e/v6e report 128 MiB, v7x 64 MiB.  Cap the scoped limit and leave
        # headroom for compiler-internal scratch / double-buffer slack.
        limit = int(min(cap // 2, 64 * 1024 * 1024))
        budget = max(8 * 1024 * 1024, limit // 2)
        return budget, limit
    except Exception:
        # Interpret mode / non-TPU backend: conservative defaults.
        return 8 * 1024 * 1024, None


def _compiler_params(dimension_semantics):
    _, limit = _vmem_config()
    return pltpu.CompilerParams(dimension_semantics=dimension_semantics,
                                vmem_limit_bytes=limit)


def _const_block_spec(shape):
    """BlockSpec for a block whose index never changes (resident weights/bias):
    request single buffering so it is not double-buffered."""
    index_map = lambda *_: (0,) * len(shape)
    try:
        return pl.BlockSpec(shape, index_map, pipeline_mode=pl.Buffered(1))
    except Exception:  # older jax without pipeline_mode: fall back gracefully
        return pl.BlockSpec(shape, index_map)


def _choose_row_tile(M, bytes_per_row, *, resident_bytes=0, budget=None,
                     max_tile=1024, min_steps=2):
    """Row tile for row-independent kernels; multiple of 8 (or full M).
    Keeps >= min_steps grid steps when possible so v7x's two TensorCores both
    get work (harmless extra step on single-TC v5e/v6e)."""
    if budget is None:
        budget, _ = _vmem_config()
    if M <= 8:
        return M
    avail = max(budget - resident_bytes, 512 * 1024)
    cap = max(8, min(max_tile, avail // max(bytes_per_row, 1)))
    if min_steps > 1 and M > 8 * min_steps:
        cap = min(cap, (M + min_steps - 1) // min_steps)
    tm = min(M, cap)
    return max(8, (tm // 8) * 8)


def _itemsize(dtype):
    return np.dtype(dtype).itemsize


# ---------------------------------------------------------------------------
# Kernel 1: fused multi-linear  y_i = x_i @ W_i + b_i  (row-tiled grid)
# ---------------------------------------------------------------------------
def _multi_linear_kernel(*refs, n_in, compute_dtype):
    x_refs = refs[:n_in]
    w_refs = refs[n_in:2 * n_in]
    b_refs = refs[2 * n_in:3 * n_in]
    o_refs = refs[3 * n_in:]
    for x_ref, w_ref, b_ref, o_ref in zip(x_refs, w_refs, b_refs, o_refs):
        x = x_ref[...].astype(compute_dtype)
        w = w_ref[...].astype(compute_dtype)       # no-op when pre-cast upstream
        y = jnp.dot(x, w, preferred_element_type=jnp.float32) + b_ref[...]
        o_ref[...] = y.astype(o_ref.dtype)


def pallas_multi_linear(xs, w_ts, bs, *, compute_dtype, out_dtype):
    """xs[i]: (M, K_i), w_ts[i]: (K_i, N_i) (already compute dtype),
    bs[i]: (1, N_i) f32. All xs share M. Returns list of (M, N_i) out_dtype."""
    n_in = len(xs)
    M = xs[0].shape[0]
    n_cols = [w.shape[1] for w in w_ts]
    budget, _ = _vmem_config()
    osz = _itemsize(out_dtype)
    # live bytes per output row: double-buffered x + out tiles, plus f32 temps.
    bytes_per_row = sum(2 * x.shape[1] * x.dtype.itemsize + 2 * n * osz + n * 4
                        for x, n in zip(xs, n_cols))
    resident = (sum(w.size * w.dtype.itemsize for w in w_ts)
                + sum(b.size * b.dtype.itemsize for b in bs))
    tm = _choose_row_tile(M, bytes_per_row, resident_bytes=resident, budget=budget)

    kernel = functools.partial(_multi_linear_kernel, n_in=n_in,
                               compute_dtype=compute_dtype)
    in_specs = (
        [pl.BlockSpec((tm, x.shape[1]), lambda i: (i, 0)) for x in xs]
        + [_const_block_spec(w.shape) for w in w_ts]
        + [_const_block_spec(b.shape) for b in bs]
    )
    out_specs = tuple(pl.BlockSpec((tm, n), lambda i: (i, 0)) for n in n_cols)
    out_shape = tuple(jax.ShapeDtypeStruct((M, n), out_dtype) for n in n_cols)

    outs = pl.pallas_call(
        kernel,
        out_shape=out_shape,
        grid=(pl.cdiv(M, tm),),
        in_specs=in_specs,
        out_specs=out_specs,
        compiler_params=_compiler_params(("parallel",)),
    )(*xs, *w_ts, *bs)
    if not isinstance(outs, (tuple, list)):
        outs = (outs,)
    return list(outs)


# ---------------------------------------------------------------------------
# Kernel 2: scaled dot-product attention (batch x Lq tiled, all heads per step)
# ---------------------------------------------------------------------------
def _attention_kernel(q_ref, k_ref, v_ref, o_ref, attn_ref=None, *,
                      n_head, d_k, d_v, compute_dtype):
    # q_ref: (bt, tq, H*dk), k_ref: (bt, Lk, H*dk), v_ref: (bt, Lk, H*dv)
    # o_ref: (bt, tq, H*dv) lane-packed over heads (feeds one big fc matmul)
    # attn_ref (optional): (H, bt, tq, Lk)
    # NOTE: 1/temperature is already folded into the q-projection weights.
    for h in range(n_head):   # static unroll; only one head's tensors live at a time
        qh = q_ref[:, :, h * d_k:(h + 1) * d_k].astype(compute_dtype)
        kh = k_ref[:, :, h * d_k:(h + 1) * d_k].astype(compute_dtype)
        vh = v_ref[:, :, h * d_v:(h + 1) * d_v].astype(compute_dtype)
        s = jnp.einsum('bqd,bkd->bqk', qh, kh, preferred_element_type=jnp.float32)
        s = s - jnp.max(s, axis=-1, keepdims=True)
        e = jnp.exp(s)
        p = e / jnp.sum(e, axis=-1, keepdims=True)   # exact softmax: rows sum to 1
        if attn_ref is not None:
            attn_ref[h] = p.astype(attn_ref.dtype)
        o = jnp.einsum('bqk,bkd->bqd', p.astype(compute_dtype), vh,
                       preferred_element_type=jnp.float32)
        o_ref[:, :, h * d_v:(h + 1) * d_v] = o.astype(o_ref.dtype)


def pallas_attention(qp, kp, vp, *, n_head, d_k, d_v, sz_b, len_q, len_k,
                     compute_dtype, out_dtype, attn_dtype=jnp.float32,
                     return_attn=True):
    """qp: (B, Lq, H*dk), kp: (B, Lk, H*dk), vp: (B, Lk, H*dv).
    Returns out (B, Lq, H*dv) lane-packed over heads and optionally
    attn (H, B, Lq, Lk)."""
    budget, _ = _vmem_config()
    qsz = qp.dtype.itemsize
    osz = _itemsize(out_dtype)
    asz = _itemsize(attn_dtype) if return_attn else 0

    # Lq tile: multiple of 8 (or full Lq when tiny).
    tq = len_q if len_q <= 8 else max(8, (min(len_q, 256) // 8) * 8)

    def step_bytes(bt, tq):
        b = 2 * bt * tq * n_head * d_k * qsz            # q tile (double-buffered)
        b += 2 * bt * len_k * n_head * d_k * qsz        # k tile
        b += 2 * bt * len_k * n_head * d_v * qsz        # v tile
        b += 2 * bt * tq * n_head * d_v * osz           # out tile
        b += 2 * n_head * bt * tq * len_k * asz         # attn tile
        b += 4 * bt * tq * len_k * 4                    # s/e/p f32 temps + headroom
        b += bt * tq * n_head * max(d_k, d_v) * 4       # per-head operand temps
        return b

    bt = sz_b
    # keep >= 2 total grid steps when possible (two TensorCores on v7x)
    if sz_b >= 2 and pl.cdiv(len_q, tq) < 2:
        bt = max(1, sz_b // 2)
    while bt > 1 and step_bytes(bt, tq) > budget:
        bt = max(1, bt // 2)
    while tq > 8 and step_bytes(bt, tq) > budget:
        tq = max(8, ((tq // 2) // 8) * 8)
    # TODO(synk): flash-tile over len_k for very long sequences.

    grid = (pl.cdiv(sz_b, bt), pl.cdiv(len_q, tq))

    kernel = functools.partial(_attention_kernel, n_head=n_head, d_k=d_k,
                               d_v=d_v, compute_dtype=compute_dtype)

    out_shape = [jax.ShapeDtypeStruct((sz_b, len_q, n_head * d_v), out_dtype)]
    out_specs = [pl.BlockSpec((bt, tq, n_head * d_v), lambda b, i: (b, i, 0))]
    if return_attn:
        out_shape.append(
            jax.ShapeDtypeStruct((n_head, sz_b, len_q, len_k), attn_dtype))
        out_specs.append(
            pl.BlockSpec((n_head, bt, tq, len_k), lambda b, i: (0, b, i, 0)))

    outs = pl.pallas_call(
        kernel,
        out_shape=tuple(out_shape),
        grid=grid,
        in_specs=[
            pl.BlockSpec((bt, tq, n_head * d_k), lambda b, i: (b, i, 0)),
            pl.BlockSpec((bt, len_k, n_head * d_k), lambda b, i: (b, 0, 0)),
            pl.BlockSpec((bt, len_k, n_head * d_v), lambda b, i: (b, 0, 0)),
        ],
        out_specs=tuple(out_specs),
        compiler_params=_compiler_params(("parallel", "parallel")),
    )(qp, kp, vp)
    if return_attn:
        return outs[0], outs[1]
    return (outs[0] if isinstance(outs, (tuple, list)) else outs), None


# ---------------------------------------------------------------------------
# Kernel 3: fc (single H*dv-contraction matmul) + residual + LayerNorm
# ---------------------------------------------------------------------------
def _fc_residual_ln_kernel(x_ref, w_ref, b_ref, res_ref, g_ref, beta_ref, o_ref,
                           *, eps, compute_dtype):
    # x_ref: (TM, H*dv) lane-packed attention output -> one MXU matmul with
    # contraction dim H*dv (instead of per-head d_v-wide matmuls).
    z = jnp.dot(x_ref[...].astype(compute_dtype), w_ref[...].astype(compute_dtype),
                preferred_element_type=jnp.float32)
    z = z + b_ref[...].astype(jnp.float32) + res_ref[...].astype(jnp.float32)
    mean = jnp.mean(z, axis=-1, keepdims=True)
    var = jnp.mean((z - mean) ** 2, axis=-1, keepdims=True)
    zn = (z - mean) * jax.lax.rsqrt(var + eps)
    o_ref[...] = (zn * g_ref[...] + beta_ref[...]).astype(o_ref.dtype)


def pallas_fc_residual_layernorm(x, w_fc_t, b_fc, residual, gamma, beta, *,
                                 eps=1e-5, compute_dtype):
    """x: (M, H*dv), w_fc_t: (H*dv, d_model) (compute dtype), residual: (M, d_model)."""
    M, hdv = x.shape
    d_model = w_fc_t.shape[-1]
    budget, _ = _vmem_config()
    bytes_per_row = (2 * hdv * x.dtype.itemsize
                     + 2 * d_model * residual.dtype.itemsize      # residual tile
                     + 2 * d_model * residual.dtype.itemsize      # out tile
                     + 4 * d_model * 4)                           # z / LN f32 temps
    resident = w_fc_t.size * w_fc_t.dtype.itemsize + 3 * d_model * 4
    tm = _choose_row_tile(M, bytes_per_row, resident_bytes=resident, budget=budget)

    kernel = functools.partial(_fc_residual_ln_kernel, eps=eps,
                               compute_dtype=compute_dtype)
    return pl.pallas_call(
        kernel,
        out_shape=jax.ShapeDtypeStruct((M, d_model), residual.dtype),
        grid=(pl.cdiv(M, tm),),
        in_specs=[
            pl.BlockSpec((tm, hdv), lambda i: (i, 0)),
            _const_block_spec(w_fc_t.shape),
            _const_block_spec(b_fc.shape),
            pl.BlockSpec((tm, d_model), lambda i: (i, 0)),
            _const_block_spec(gamma.shape),
            _const_block_spec(beta.shape),
        ],
        out_specs=pl.BlockSpec((tm, d_model), lambda i: (i, 0)),
        compiler_params=_compiler_params(("parallel",)),
    )(x, w_fc_t, b_fc, residual, gamma, beta)


# ---------------------------------------------------------------------------
# MultiHeadAttention forward (all heavy lifting in Pallas; glue is free reshapes)
# ---------------------------------------------------------------------------
def multi_head_attention_forward(params, q, k, v, *, compute_dtype=jnp.bfloat16,
                                 return_attn=True, attn_dtype=jnp.float32):
    """Eval-mode forward of the PyTorch MultiHeadAttention module.

    compute_dtype: MXU operand dtype (bf16 default; accumulation is always f32).
    return_attn / attn_dtype: the attention-probability tensor dominates HBM
    writes at realistic sizes; disable it or store it in bf16 when not needed.
    """
    n_head, d_k, d_v = params["n_head"], params["d_k"], params["d_v"]
    sz_b, len_q, d_model = q.shape
    _, len_k, _ = k.shape
    _, len_v, _ = v.shape
    assert len_k == len_v, "attention requires len_k == len_v"

    inv_temp = 1.0 / float(np.power(d_k, 0.5))
    # Fold 1/temperature into the q projection (one-time weight rescale, off the
    # hot path) and pre-cast MXU weight operands to the compute dtype once.
    w_qs_t = (params["w_qs_t"] * inv_temp).astype(compute_dtype)
    b_qs = params["b_qs"] * inv_temp                      # bias stays f32
    w_ks_t = params["w_ks_t"].astype(compute_dtype)
    w_vs_t = params["w_vs_t"].astype(compute_dtype)
    w_fc_t = params["w_fc_t"].astype(compute_dtype)

    residual2d = q.reshape(sz_b * len_q, d_model)
    q2d = q.reshape(sz_b * len_q, d_model)
    k2d = k.reshape(sz_b * len_k, d_model)
    v2d = v.reshape(sz_b * len_v, d_model)

    # Fused Q/K/V projections (one pallas_call when sequence lengths match).
    # Projection outputs are emitted in the compute dtype so the stage boundary
    # (written + re-read through HBM) is half width under bf16.
    if len_q == len_k:
        qp, kp, vp = pallas_multi_linear(
            [q2d, k2d, v2d], [w_qs_t, w_ks_t, w_vs_t],
            [b_qs, params["b_ks"], params["b_vs"]],
            compute_dtype=compute_dtype, out_dtype=compute_dtype)
    else:
        (qp,) = pallas_multi_linear([q2d], [w_qs_t], [b_qs],
                                    compute_dtype=compute_dtype,
                                    out_dtype=compute_dtype)
        kp, vp = pallas_multi_linear(
            [k2d, v2d], [w_ks_t, w_vs_t], [params["b_ks"], params["b_vs"]],
            compute_dtype=compute_dtype, out_dtype=compute_dtype)

    # Free (contiguous) reshapes only; the (B,L,H,d)->(H,B,L,d) permute is
    # realized by static per-head column slices inside the attention kernel.
    qp = qp.reshape(sz_b, len_q, n_head * d_k)
    kp = kp.reshape(sz_b, len_k, n_head * d_k)
    vp = vp.reshape(sz_b, len_k, n_head * d_v)

    out_cat, attn = pallas_attention(
        qp, kp, vp, n_head=n_head, d_k=d_k, d_v=d_v,
        sz_b=sz_b, len_q=len_q, len_k=len_k,
        compute_dtype=compute_dtype, out_dtype=compute_dtype,
        attn_dtype=attn_dtype, return_attn=return_attn)

    # out_cat is already the lane-packed head concat (B, Lq, H*dv); the fc stage
    # is a single (tm, H*dv) x (H*dv, d_model) MXU matmul fused with +residual
    # and LayerNorm.
    out2d = out_cat.reshape(sz_b * len_q, n_head * d_v)
    final = pallas_fc_residual_layernorm(
        out2d, w_fc_t, params["b_fc"], residual2d,
        params["ln_gamma"], params["ln_beta"], compute_dtype=compute_dtype)

    final = final.reshape(sz_b, len_q, d_model)
    if return_attn:
        attn = attn.reshape(n_head * sz_b, len_q, len_k)
    return final, attn


# ---------------------------------------------------------------------------
# Deterministic parameter initialization (mirrors the PyTorch __init__)
# ---------------------------------------------------------------------------
def init_params(key, n_head, d_model, d_k, d_v):
    keys = jax.random.split(key, 8)
    std_qk = np.sqrt(2.0 / (d_model + d_k))
    std_v = np.sqrt(2.0 / (d_model + d_v))
    # PyTorch Linear stores W as (out, in); we keep the transposed (in, out) copy.
    w_qs = jax.random.normal(keys[0], (n_head * d_k, d_model), jnp.float32) * std_qk
    w_ks = jax.random.normal(keys[1], (n_head * d_k, d_model), jnp.float32) * std_qk
    w_vs = jax.random.normal(keys[2], (n_head * d_v, d_model), jnp.float32) * std_v
    bnd = 1.0 / np.sqrt(d_model)
    b_qs = jax.random.uniform(keys[3], (1, n_head * d_k), jnp.float32, -bnd, bnd)
    b_ks = jax.random.uniform(keys[4], (1, n_head * d_k), jnp.float32, -bnd, bnd)
    b_vs = jax.random.uniform(keys[5], (1, n_head * d_v), jnp.float32, -bnd, bnd)
    fc_in, fc_out = n_head * d_v, d_model
    std_fc = np.sqrt(2.0 / (fc_in + fc_out))
    w_fc = jax.random.normal(keys[6], (fc_out, fc_in), jnp.float32) * std_fc
    bnd_fc = 1.0 / np.sqrt(fc_in)
    b_fc = jax.random.uniform(keys[7], (1, fc_out), jnp.float32, -bnd_fc, bnd_fc)
    return {
        "n_head": n_head, "d_k": d_k, "d_v": d_v,
        "w_qs_t": w_qs.T, "b_qs": b_qs,
        "w_ks_t": w_ks.T, "b_ks": b_ks,
        "w_vs_t": w_vs.T, "b_vs": b_vs,
        "w_fc_t": w_fc.T, "b_fc": b_fc,
        "ln_gamma": jnp.ones((1, d_model), jnp.float32),
        "ln_beta": jnp.zeros((1, d_model), jnp.float32),
    }


# ---------------------------------------------------------------------------
# Pure-JAX reference (mirrors the PyTorch forward in eval mode)
# ---------------------------------------------------------------------------
def reference_forward(params, q, k, v):
    n_head, d_k, d_v = params["n_head"], params["d_k"], params["d_v"]
    sz_b, len_q, d_model = q.shape
    _, len_k, _ = k.shape
    residual = q.reshape(-1, d_model)
    qp = q.reshape(-1, d_model) @ params["w_qs_t"] + params["b_qs"]
    kp = k.reshape(-1, d_model) @ params["w_ks_t"] + params["b_ks"]
    vp = v.reshape(-1, d_model) @ params["w_vs_t"] + params["b_vs"]
    qp = qp.reshape(sz_b, len_q, n_head, d_k).transpose(2, 0, 1, 3).reshape(-1, len_q, d_k)
    kp = kp.reshape(sz_b, len_k, n_head, d_k).transpose(2, 0, 1, 3).reshape(-1, len_k, d_k)
    vp = vp.reshape(sz_b, len_k, n_head, d_v).transpose(2, 0, 1, 3).reshape(-1, len_k, d_v)
    attn = jnp.einsum('bqd,bkd->bqk', qp, kp) / np.power(d_k, 0.5)
    attn = jax.nn.softmax(attn, axis=-1)
    out = jnp.einsum('bqk,bkd->bqd', attn, vp)
    out = out.reshape(n_head, sz_b, len_q, d_v).transpose(1, 2, 0, 3)
    out = out.reshape(sz_b * len_q, n_head * d_v)
    y = out @ params["w_fc_t"] + params["b_fc"] + residual
    mean = y.mean(-1, keepdims=True)
    var = ((y - mean) ** 2).mean(-1, keepdims=True)
    y = (y - mean) * jax.lax.rsqrt(var + 1e-5) * params["ln_gamma"] + params["ln_beta"]
    return y.reshape(sz_b, len_q, d_model), attn


if __name__ == "__main__":
    # Small shapes consistent with the module's forward.
    sz_b, seq_len, d_model = 2, 8, 32
    n_head, d_k, d_v = 2, 16, 16

    key = jax.random.PRNGKey(0)
    kp_, kq, kk, kv = jax.random.split(key, 4)
    params = init_params(kp_, n_head, d_model, d_k, d_v)

    q = jax.random.normal(kq, (sz_b, seq_len, d_model), jnp.float32)
    k = jax.random.normal(kk, (sz_b, seq_len, d_model), jnp.float32)
    v = jax.random.normal(kv, (sz_b, seq_len, d_model), jnp.float32)

    ref_out, ref_attn = reference_forward(params, q, k, v)
    ref_out = np.asarray(ref_out)
    ref_attn = np.asarray(ref_attn)

    # --- f32 compute path (close to the PyTorch numerics) -------------------
    out32, attn32 = multi_head_attention_forward(params, q, k, v,
                                                 compute_dtype=jnp.float32)
    out32 = np.asarray(jax.block_until_ready(out32))
    attn32 = np.asarray(jax.block_until_ready(attn32))
    assert out32.shape == (sz_b, seq_len, d_model)
    assert attn32.shape == (n_head * sz_b, seq_len, seq_len)
    # exact softmax -> rows sum to 1 (to f32 rounding)
    assert float(np.max(np.abs(attn32.sum(-1) - 1.0))) < 1e-3
    # loose-but-meaningful bounds so the check also holds under the TPU MXU's
    # default f32 matmul precision (interpret/CPU matches to ~1e-6).
    assert float(np.max(np.abs(out32 - ref_out))) < 2e-2
    assert float(np.max(np.abs(attn32 - ref_attn))) < 1e-2

    # --- default path (bf16 MXU operands, f32 accumulation) -----------------
    out_bf, attn_bf = multi_head_attention_forward(params, q, k, v)
    out_bf = np.asarray(jax.block_until_ready(out_bf))
    attn_bf = np.asarray(jax.block_until_ready(attn_bf))
    assert out_bf.shape == (sz_b, seq_len, d_model)
    assert attn_bf.shape == (n_head * sz_b, seq_len, seq_len)
    assert float(np.max(np.abs(attn_bf.sum(-1) - 1.0))) < 1e-3
    assert float(np.max(np.abs(out_bf - ref_out))) < 1e-1
    assert float(np.max(np.abs(attn_bf - ref_attn))) < 5e-2

    print("KERNEL_OK")
</pallas_src>

<mosaic_0001>
module attributes {stable_mosaic.version = 11 : i64} {
  func.func @_multi_linear_kernel(%arg0: i32, %arg1: memref<16x32xf32, #tpu.memory_space<vmem>>, %arg2: memref<16x32xf32, #tpu.memory_space<vmem>>, %arg3: memref<16x32xf32, #tpu.memory_space<vmem>>, %arg4: memref<32x32xf32, #tpu.memory_space<vmem>>, %arg5: memref<32x32xf32, #tpu.memory_space<vmem>>, %arg6: memref<32x32xf32, #tpu.memory_space<vmem>>, %arg7: memref<1x32xf32, #tpu.memory_space<vmem>>, %arg8: memref<1x32xf32, #tpu.memory_space<vmem>>, %arg9: memref<1x32xf32, #tpu.memory_space<vmem>>, %arg10: memref<16x32xf32, #tpu.memory_space<vmem>>, %arg11: memref<16x32xf32, #tpu.memory_space<vmem>>, %arg12: memref<16x32xf32, #tpu.memory_space<vmem>>) attributes {dimension_semantics = [#tpu.dimension_semantics<parallel>], iteration_bounds = array<i64: 1>, scalar_prefetch = 0 : i64, scratch_operands = 0 : i64, tpu.core_type = #tpu.core_type<tc>, window_params = [{transform_indices = @transform_0, window_bounds = array<i64: 16, 32>}, {transform_indices = @transform_1, window_bounds = array<i64: 16, 32>}, {transform_indices = @transform_2, window_bounds = array<i64: 16, 32>}, {pipeline_mode = #tpu.pipeline_mode<synchronous>, transform_indices = @transform_3, window_bounds = array<i64: 32, 32>}, {pipeline_mode = #tpu.pipeline_mode<synchronous>, transform_indices = @transform_4, window_bounds = array<i64: 32, 32>}, {pipeline_mode = #tpu.pipeline_mode<synchronous>, transform_indices = @transform_5, window_bounds = array<i64: 32, 32>}, {pipeline_mode = #tpu.pipeline_mode<synchronous>, transform_indices = @transform_6, window_bounds = array<i64: 1, 32>}, {pipeline_mode = #tpu.pipeline_mode<synchronous>, transform_indices = @transform_7, window_bounds = array<i64: 1, 32>}, {pipeline_mode = #tpu.pipeline_mode<synchronous>, transform_indices = @transform_8, window_bounds = array<i64: 1, 32>}, {transform_indices = @transform_9, window_bounds = array<i64: 16, 32>}, {transform_indices = @transform_10, window_bounds = array<i64: 16, 32>}, {transform_indices = @transform_11, window_bounds = array<i64: 16, 32>}]} {
    %c0 = arith.constant 0 : index
    %c0_0 = arith.constant 0 : index
    %0 = vector.load %arg1[%c0, %c0_0] : memref<16x32xf32, #tpu.memory_space<vmem>>, vector<16x32xf32>
    %c0_1 = arith.constant 0 : index
    %c0_2 = arith.constant 0 : index
    %1 = vector.load %arg4[%c0_1, %c0_2] : memref<32x32xf32, #tpu.memory_space<vmem>>, vector<32x32xf32>
    %cst = arith.constant dense<0.000000e+00> : vector<16x32xf32>
    %2 = tpu.matmul %0, %1, %cst {dimension_numbers = #tpu.dot_dimension_numbers<[1], [0], [0], [1], [0, 0, 1, 1], [], []>} : vector<16x32xf32>, vector<32x32xf32>, vector<16x32xf32> -> vector<16x32xf32>
    %c0_3 = arith.constant 0 : index
    %c0_4 = arith.constant 0 : index
    %3 = vector.load %arg7[%c0_3, %c0_4] : memref<1x32xf32, #tpu.memory_space<vmem>>, vector<1x32xf32>
    %4 = vector.broadcast %3 : vector<1x32xf32> to vector<16x32xf32>
    %5 = arith.addf %2, %4 : vector<16x32xf32>
    %c0_5 = arith.constant 0 : index
    %c0_6 = arith.constant 0 : index
    %6 = vector.load %arg10[%c0_5, %c0_6] : memref<16x32xf32, #tpu.memory_space<vmem>>, vector<16x32xf32>
    tpu.vector_store %arg10[%c0_5, %c0_6], %5 {strides = array<i32>} : memref<16x32xf32, #tpu.memory_space<vmem>>, vector<16x32xf32>,
    %c0_7 = arith.constant 0 : index
    %c0_8 = arith.constant 0 : index
    %7 = vector.load %arg2[%c0_7, %c0_8] : memref<16x32xf32, #tpu.memory_space<vmem>>, vector<16x32xf32>
    %c0_9 = arith.constant 0 : index
    %c0_10 = arith.constant 0 : index
    %8 = vector.load %arg5[%c0_9, %c0_10] : memref<32x32xf32, #tpu.memory_space<vmem>>, vector<32x32xf32>
    %cst_11 = arith.constant dense<0.000000e+00> : vector<16x32xf32>
    %9 = tpu.matmul %7, %8, %cst_11 {dimension_numbers = #tpu.dot_dimension_numbers<[1], [0], [0], [1], [0, 0, 1, 1], [], []>} : vector<16x32xf32>, vector<32x32xf32>, vector<16x32xf32> -> vector<16x32xf32>
    %c0_12 = arith.constant 0 : index
    %c0_13 = arith.constant 0 : index
    %10 = vector.load %arg8[%c0_12, %c0_13] : memref<1x32xf32, #tpu.memory_space<vmem>>, vector<1x32xf32>
    %11 = vector.broadcast %10 : vector<1x32xf32> to vector<16x32xf32>
    %12 = arith.addf %9, %11 : vector<16x32xf32>
    %c0_14 = arith.constant 0 : index
    %c0_15 = arith.constant 0 : index
    %13 = vector.load %arg11[%c0_14, %c0_15] : memref<16x32xf32, #tpu.memory_space<vmem>>, vector<16x32xf32>
    tpu.vector_store %arg11[%c0_14, %c0_15], %12 {strides = array<i32>} : memref<16x32xf32, #tpu.memory_space<vmem>>, vector<16x32xf32>,
    %c0_16 = arith.constant 0 : index
    %c0_17 = arith.constant 0 : index
    %14 = vector.load %arg3[%c0_16, %c0_17] : memref<16x32xf32, #tpu.memory_space<vmem>>, vector<16x32xf32>
    %c0_18 = arith.constant 0 : index
    %c0_19 = arith.constant 0 : index
    %15 = vector.load %arg6[%c0_18, %c0_19] : memref<32x32xf32, #tpu.memory_space<vmem>>, vector<32x32xf32>
    %cst_20 = arith.constant dense<0.000000e+00> : vector<16x32xf32>
    %16 = tpu.matmul %14, %15, %cst_20 {dimension_numbers = #tpu.dot_dimension_numbers<[1], [0], [0], [1], [0, 0, 1, 1], [], []>} : vector<16x32xf32>, vector<32x32xf32>, vector<16x32xf32> -> vector<16x32xf32>
    %c0_21 = arith.constant 0 : index
    %c0_22 = arith.constant 0 : index
    %17 = vector.load %arg9[%c0_21, %c0_22] : memref<1x32xf32, #tpu.memory_space<vmem>>, vector<1x32xf32>
    %18 = vector.broadcast %17 : vector<1x32xf32> to vector<16x32xf32>
    %19 = arith.addf %16, %18 : vector<16x32xf32>
    %c0_23 = arith.constant 0 : index
    %c0_24 = arith.constant 0 : index
    %20 = vector.load %arg12[%c0_23, %c0_24] : memref<16x32xf32, #tpu.memory_space<vmem>>, vector<16x32xf32>
    tpu.vector_store %arg12[%c0_23, %c0_24], %19 {strides = array<i32>} : memref<16x32xf32, #tpu.memory_space<vmem>>, vector<16x32xf32>,
    return
  }
  func.func @transform_0(%arg0: i32) -> (i32, i32) {
    %c0_i32 = arith.constant 0 : i32
    %c0_i32_0 = arith.constant 0 : i32
    return %arg0, %c0_i32 : i32, i32
  }
  func.func @transform_1(%arg0: i32) -> (i32, i32) {
    %c0_i32 = arith.constant 0 : i32
    %c0_i32_0 = arith.constant 0 : i32
    return %arg0, %c0_i32 : i32, i32
  }
  func.func @transform_2(%arg0: i32) -> (i32, i32) {
    %c0_i32 = arith.constant 0 : i32
    %c0_i32_0 = arith.constant 0 : i32
    return %arg0, %c0_i32 : i32, i32
  }
  func.func @transform_3(%arg0: i32) -> (i32, i32) {
    %c0_i32 = arith.constant 0 : i32
    %c0_i32_0 = arith.constant 0 : i32
    %c0_i32_1 = arith.constant 0 : i32
    return %c0_i32, %c0_i32_0 : i32, i32
  }
  func.func @transform_4(%arg0: i32) -> (i32, i32) {
    %c0_i32 = arith.constant 0 : i32
    %c0_i32_0 = arith.constant 0 : i32
    %c0_i32_1 = arith.constant 0 : i32
    return %c0_i32, %c0_i32_0 : i32, i32
  }
  func.func @transform_5(%arg0: i32) -> (i32, i32) {
    %c0_i32 = arith.constant 0 : i32
    %c0_i32_0 = arith.constant 0 : i32
    %c0_i32_1 = arith.constant 0 : i32
    return %c0_i32, %c0_i32_0 : i32, i32
  }
  func.func @transform_6(%arg0: i32) -> (i32, i32) {
    %c0_i32 = arith.constant 0 : i32
    %c0_i32_0 = arith.constant 0 : i32
    %c0_i32_1 = arith.constant 0 : i32
    return %c0_i32, %c0_i32_0 : i32, i32
  }
  func.func @transform_7(%arg0: i32) -> (i32, i32) {
    %c0_i32 = arith.constant 0 : i32
    %c0_i32_0 = arith.constant 0 : i32
    %c0_i32_1 = arith.constant 0 : i32
    return %c0_i32, %c0_i32_0 : i32, i32
  }
  func.func @transform_8(%arg0: i32) -> (i32, i32) {
    %c0_i32 = arith.constant 0 : i32
    %c0_i32_0 = arith.constant 0 : i32
    %c0_i32_1 = arith.constant 0 : i32
    return %c0_i32, %c0_i32_0 : i32, i32
  }
  func.func @transform_9(%arg0: i32) -> (i32, i32) {
    %c0_i32 = arith.constant 0 : i32
    %c0_i32_0 = arith.constant 0 : i32
    return %arg0, %c0_i32 : i32, i32
  }
  func.func @transform_10(%arg0: i32) -> (i32, i32) {
    %c0_i32 = arith.constant 0 : i32
    %c0_i32_0 = arith.constant 0 : i32
    return %arg0, %c0_i32 : i32, i32
  }
  func.func @transform_11(%arg0: i32) -> (i32, i32) {
    %c0_i32 = arith.constant 0 : i32
    %c0_i32_0 = arith.constant 0 : i32
    return %arg0, %c0_i32 : i32, i32
  }
}

</mosaic_0001>

<bundles_post_ra>
// kernel: tpu_custom_call.1
= control target key start
LH: loop header
LB: loop body
LE: loop exit
PB: predicated region body
PF: predicated region fallthrough
CT: control target
= control target key end

     0   :  { %17 = vsyncpa [#allocation3], 0  ;;  %s1019_s0 = inlined_call_operand.hbm [shape: f32[16,32], index: 0, kind: input, shape index: {}]   ;;  %s1020_s1 = inlined_call_operand.hbm [shape: f32[16,32], index: 1, kind: input, shape index: {}]   ;;  %s1021_s2 = inlined_call_operand.hbm [shape: f32[16,32], index: 2, kind: input, shape index: {}]   ;;  %s1022_s3 = inlined_call_operand.hbm [shape: f32[32,32], index: 3, kind: input, shape index: {}]   ;;  %s1023_s4 = inlined_call_operand.hbm [shape: f32[32,32], index: 4, kind: input, shape index: {}]   ;;  %s1024_s5 = inlined_call_operand.hbm [shape: f32[32,32], index: 5, kind: input, shape index: {}]   ;;  %s1025_s6 = inlined_call_operand.vmem [shape: f32[1,32], index: 6, kind: input, shape index: {}]   ;;  %s1026_s7 = inlined_call_operand.vmem [shape: f32[1,32], index: 7, kind: input, shape index: {}]   ;;  %s1027_s8 = inlined_call_operand.vmem [shape: f32[1,32], index: 8, kind: input, shape index: {}]   ;;  %s1028_s9 = inlined_call_operand.hbm [shape: f32[16,32], index: 9, kind: output, shape index: {0}]   ;;  %s1029_s10 = inlined_call_operand.hbm [shape: f32[16,32], index: 10, kind: output, shape index: {1}]   ;;  %s1030_s11 = inlined_call_operand.hbm [shape: f32[16,32], index: 11, kind: output, shape index: {2}]  }
   0x1   :  { %18 = vsyncpa [#allocation6], 0 }
   0x2   :  { %19 = vsyncpa [#allocation9], 0 }
   0x3   :  { %20 = vsyncpa [#allocation12], 0 }
   0x4   :  { %21 = vsyncpa [#allocation4], 0 }
   0x5   :  { %22 = vsyncpa [#allocation15], 0  ;;  %s764_s17 = smov [#allocation5]   ;;  %s765_s19 = smov [#allocation8]  }
   0x6   :  { %s40_s18 = sshll.u32 %s764_s17, 4  ;;  %s64_s20 = sshll.u32 %s765_s19, 4  ;;  %s41_s18 = int_to_ptr.vmem [resolvable:$true] %s40_s18  ;;  %s835_s20 = int_to_ptr.vmem [resolvable:$true] %s64_s20 }
   0x7   :  { %s554_s23 = scalar_lea.hbm %s1020_s1, 256 }
   0x8   :  { %p555_p0 = scmp.ne.s32.totalorder %s1020_s1, %s554_s23  ;;  %p558_p1 = scmp.lt.u32.totalorder %s554_s23, %s1020_s1 }
   0xa   :  { %p560_p2 = pnand %p558_p1, %p555_p0 }
   0xc   :  { %563 = shalt.err (!%p560_p2)
}
   0xd   :  { %s564_s28 = scalar_lea.vmem %s41_s18, 256  ;;  %p569_p4 = scmp.lt.s32.totalorder %s41_s18, %s41_s18 }
   0xe   :  { %p565_p3 = scmp.ne.s32.totalorder %s41_s18, %s564_s28  ;;  %p570_p5 = scmp.lt.s32.totalorder %s564_s28, %s564_s28 }
  0x10   :  { %p571_p6 = por %p570_p5, %p569_p4 }
  0x12   :  { %p572_p7 = pnand %p571_p6, %p565_p3 }
  0x14   :  { %575 = shalt.err (!%p572_p7)
}
  0x15   :  { %s766_s29 = smov 128   ;;  %s767_s30 = smov 8  }
  0x16   :  { %46 = dma.hbm_to_vmem [thread:$0]  %s1020_s1, 256, %s41_s18, [#allocation6], %s766_s29, %s766_s29, %s767_s30  }
  0x17   :  { %s576_s16 = scalar_lea.hbm %s1022_s3, 512 }
  0x18   :  { %p577_p8 = scmp.ne.s32.totalorder %s1022_s3, %s576_s16  ;;  %p580_p9 = scmp.lt.u32.totalorder %s576_s16, %s1022_s3 }
  0x1a   :  { %p582_p10 = pnand %p580_p9, %p577_p8 }
  0x1c   :  { %585 = shalt.err (!%p582_p10)
}
  0x1d   :  { %s586_s23 = scalar_lea.vmem %s835_s20, 512  ;;  %p591_p12 = scmp.lt.s32.totalorder %s835_s20, %s835_s20 }
  0x1e   :  { %p587_p11 = scmp.ne.s32.totalorder %s835_s20, %s586_s23  ;;  %p592_p13 = scmp.lt.s32.totalorder %s586_s23, %s586_s23 }
  0x20   :  { %p593_p0 = por %p592_p13, %p591_p12 }
  0x22   :  { %p594_p1 = pnand %p593_p0, %p587_p11 }
  0x24   :  { %597 = shalt.err (!%p594_p1)
}
  0x25   :  { %70 = dma.hbm_to_vmem [thread:$0]  %s1022_s3, 512, %s835_s20, [#allocation9], %s766_s29, %s766_s29, %s767_s30  }
  0x26   :  { %s768_s24 = smov [#allocation2]   ;;  %s769_s26 = smov [#allocation7]  }
  0x27   :  { %s28_s25 = sshll.u32 %s768_s24, 4  ;;  %s52_s27 = sshll.u32 %s769_s26, 4  ;;  %s29_s25 = int_to_ptr.vmem [resolvable:$true] %s28_s25  ;;  %s872_s27 = int_to_ptr.vmem [resolvable:$true] %s52_s27 }
  0x28   :  { %s598_s13 = scalar_lea.hbm %s1019_s0, 256 }
  0x29   :  { %p599_p2 = scmp.ne.s32.totalorder %s1019_s0, %s598_s13  ;;  %p602_p3 = scmp.lt.u32.totalorder %s598_s13, %s1019_s0 }
  0x2b   :  { %p604_p4 = pnand %p602_p3, %p599_p2 }
  0x2d   :  { %607 = shalt.err (!%p604_p4)
}
  0x2e   :  { %s608_s3 = scalar_lea.vmem %s29_s25, 256  ;;  %p613_p6 = scmp.lt.s32.totalorder %s29_s25, %s29_s25 }
  0x2f   :  { %p609_p5 = scmp.ne.s32.totalorder %s29_s25, %s608_s3  ;;  %p614_p7 = scmp.lt.s32.totalorder %s608_s3, %s608_s3 }
  0x31   :  { %p615_p8 = por %p614_p7, %p613_p6 }
  0x33   :  { %p616_p9 = pnand %p615_p8, %p609_p5 }
  0x35   :  { %619 = shalt.err (!%p616_p9)
}
  0x36   :  { %34 = dma.hbm_to_vmem [thread:$0]  %s1019_s0, 256, %s29_s25, [#allocation3], %s766_s29, %s766_s29, %s767_s30  }
  0x37   :  { %s620_s23 = scalar_lea.hbm %s1021_s2, 256 }
  0x38   :  { %p621_p10 = scmp.ne.s32.totalorder %s1021_s2, %s620_s23  ;;  %p624_p11 = scmp.lt.u32.totalorder %s620_s23, %s1021_s2 }
  0x3a   :  { %p626_p12 = pnand %p624_p11, %p621_p10 }
  0x3c   :  { %629 = shalt.err (!%p626_p12)
}
  0x3d   :  { %s630_s28 = scalar_lea.vmem %s872_s27, 256  ;;  %p635_p0 = scmp.lt.s32.totalorder %s872_s27, %s872_s27 }
  0x3e   :  { %p631_p13 = scmp.ne.s32.totalorder %s872_s27, %s630_s28  ;;  %p636_p1 = scmp.lt.s32.totalorder %s630_s28, %s630_s28 }
  0x40   :  { %p637_p2 = por %p636_p1, %p635_p0 }
  0x42   :  { %p638_p3 = pnand %p637_p2, %p631_p13 }
  0x44   :  { %641 = shalt.err (!%p638_p3)
}
  0x45   :  { %58 = dma.hbm_to_vmem [thread:$0]  %s1021_s2, 256, %s872_s27, [#allocation6], %s766_s29, %s766_s29, %s767_s30  }
  0x46   :  { %s770_s12 = smov [#allocation10]   ;;  %s771_s14 = smov [#allocation11]  }
  0x47   :  { %s76_s13 = sshll.u32 %s770_s12, 4  ;;  %s88_s15 = sshll.u32 %s771_s14, 4  ;;  %s77_s13 = int_to_ptr.vmem [resolvable:$true] %s76_s13  ;;  %s909_s15 = int_to_ptr.vmem [resolvable:$true] %s88_s15 }
  0x48   :  { %s642_s3 = scalar_lea.hbm %s1023_s4, 512 }
  0x49   :  { %p643_p4 = scmp.ne.s32.totalorder %s1023_s4, %s642_s3  ;;  %p646_p5 = scmp.lt.u32.totalorder %s642_s3, %s1023_s4 }
  0x4b   :  { %p648_p6 = pnand %p646_p5, %p643_p4 }
  0x4d   :  { %651 = shalt.err (!%p648_p6)
}
  0x4e   :  { %s652_s2 = scalar_lea.vmem %s77_s13, 512  ;;  %p657_p8 = scmp.lt.s32.totalorder %s77_s13, %s77_s13 }
  0x4f   :  { %p653_p7 = scmp.ne.s32.totalorder %s77_s13, %s652_s2  ;;  %p658_p9 = scmp.lt.s32.totalorder %s652_s2, %s652_s2 }
  0x51   :  { %p659_p10 = por %p658_p9, %p657_p8 }
  0x53   :  { %p660_p11 = pnand %p659_p10, %p653_p7 }
  0x55   :  { %663 = shalt.err (!%p660_p11)
}
  0x56   :  { %82 = dma.hbm_to_vmem [thread:$0]  %s1023_s4, 512, %s77_s13, [#allocation9], %s766_s29, %s766_s29, %s767_s30  }
  0x57   :  { %s664_s24 = scalar_lea.hbm %s1024_s5, 512 }
  0x58   :  { %p665_p12 = scmp.ne.s32.totalorder %s1024_s5, %s664_s24  ;;  %p668_p13 = scmp.lt.u32.totalorder %s664_s24, %s1024_s5 }
  0x5a   :  { %p670_p0 = pnand %p668_p13, %p665_p12 }
  0x5c   :  { %673 = shalt.err (!%p670_p0)
}
  0x5d   :  { %s674_s12 = scalar_lea.vmem %s909_s15, 512  ;;  %p679_p2 = scmp.lt.s32.totalorder %s909_s15, %s909_s15 }
  0x5e   :  { %p675_p1 = scmp.ne.s32.totalorder %s909_s15, %s674_s12  ;;  %p680_p3 = scmp.lt.s32.totalorder %s674_s12, %s674_s12 }
  0x60   :  { %p681_p4 = por %p680_p3, %p679_p2 }
  0x62   :  { %p682_p5 = pnand %p681_p4, %p675_p1 }
  0x64   :  { %685 = shalt.err (!%p682_p5)
}
  0x65   :  { %94 = dma.hbm_to_vmem [thread:$0]  %s1024_s5, 512, %s909_s15, [#allocation12], %s766_s29, %s766_s29, %s767_s30  }
  0x66   :  { %752 = dma.done.wait [#allocation3], 256  }
  0x67   :  { %753 = vsyncadd [#allocation3], 4294967040 }
  0x68   :  { %754 = dma.done.wait [#allocation6], 512  }
  0x69   :  { %755 = vsyncadd [#allocation6], 4294966784 }
  0x6a   :  { %756 = dma.done.wait [#allocation9], 1024  }
  0x6b   :  { %757 = vsyncadd [#allocation9], 4294966272 }
  0x6c   :  { %758 = dma.done.wait [#allocation12], 512  }
  0x6d   :  { %759 = vsyncadd [#allocation12], 4294966784  ;;  %v121_v0 = vld [vmem:[#allocation8] sm:$0xff]  ;;  %v122_v1 = vld [vmem:[#allocation8 + $0x8] sm:$0xff]  ;;  %vm132_vm0 = vcmask 261120   ;;  %s772_s17 = smov [#allocation13]  }
  0x6e   :  { %v123_v2 = vld [vmem:[#allocation8 + $0x10] sm:$0xff]  ;;  %v519_v3 = vpack.c.bf16 %v122_v1, %v121_v0  ;;  %v124_v4 = vld [vmem:[#allocation8 + $0x18] sm:$0xff]  ;;  %v218_v5 = vld [vmem:[#allocation10] sm:$0xff]  ;;  %s413_s3 = sshll.u32 %s772_s17, 4  ;;  %s773_s20 = smov [#allocation14]   ;;  %s414_s3 = int_to_ptr.vmem [resolvable:$true] %s413_s3 }
  0x6f   :  { %v219_v6 = vld [vmem:[#allocation10 + $0x8] sm:$0xff]  ;;  %v523_v7 = vpack.c.bf16 %v124_v4, %v123_v2  ;;  %v119_v9 = vld [vmem:[#allocation2] sm:$0xff]  ;;  %v314_v10 = vld [vmem:[#allocation11] sm:$0xff]  ;;  %s425_s19 = sshll.u32 %s773_s20, 4  ;;  %s686_s21 = scalar_lea.vmem %s414_s3, 256  ;;  %s959_s19 = int_to_ptr.vmem [resolvable:$true] %s425_s19 }
  0x70   :  { %v527_v8 = vpack.c.bf16 %v219_v6, %v218_v5  ;;  %520 = vmatprep.subr.bf16.mxu0 %v519_v3  ;;  %494 = vmatprep.mubr.msk.f32.mxu0 %vm132_vm0, %v119_v9  ;;  %v315_v11 = vld [vmem:[#allocation11 + $0x8] sm:$0xff]  ;;  %v220_v12 = vld [vmem:[#allocation10 + $0x10] sm:$0xff]  ;;  %v221_v13 = vld [vmem:[#allocation10 + $0x18] sm:$0xff]  ;;  %p687_p6 = scmp.ne.s32.totalorder %s414_s3, %s686_s21  ;;  %p691_p7 = scmp.lt.s32.totalorder %s414_s3, %s414_s3 }
  0x71   :  { %522 = vmatpush3.bf16.msra.mxu0 %v519_v3  ;;  %v531_v14 = vpack.c.bf16 %v221_v13, %v220_v12  ;;  %v216_v15 = vld [vmem:[#allocation5] sm:$0xff]  ;;  %v535_v16 = vpack.c.bf16 %v315_v11, %v314_v10  ;;  %v316_v17 = vld [vmem:[#allocation11 + $0x10] sm:$0xff]  ;;  %v317_v18 = vld [vmem:[#allocation11 + $0x18] sm:$0xff]  ;;  %p692_p8 = scmp.lt.s32.totalorder %s686_s21, %s686_s21 }
  0x72   :  { %528 = vmatprep.subr.bf16.mxu1 %v527_v8  ;;  %524 = vmatprep.subr.bf16.mxu0 %v523_v7  ;;  %v120_v19 = vld [vmem:[#allocation2 + $0x8] sm:$0xff]  ;;  %v539_v20 = vpack.c.bf16 %v317_v18, %v316_v17  ;;  %v217_v21 = vld [vmem:[#allocation5 + $0x8] sm:$0xff]  ;;  %v312_v22 = vld [vmem:[#allocation7] sm:$0xff] }
  0x73   :  { %530 = vmatpush3.bf16.msra.mxu1 %v527_v8  ;;  %505 = vmatprep.mubr.msk.f32.mxu1 %vm132_vm0, %v216_v15  ;;  %v313_v23 = vld [vmem:[#allocation7 + $0x8] sm:$0xff]  ;;  %v459_v24 = vld [vmem:[%s1025_s6] ss:$0 sm:$0xff]  ;;  %p693_p9 = por %p692_p8, %p691_p7 }
  0x74   :  { %532 = vmatprep.subr.bf16.mxu1 %v531_v14  ;;  %v462_v25 = vld [vmem:[%s1026_s7] ss:$0 sm:$0xff] }
  0x75   :  { %526 = vmatpush3.bf16.msra.mxu0 %v523_v7  ;;  %v465_v34 = vld [vmem:[%s1027_s8] ss:$0 sm:$0xff]  ;;  %p694_p10 = pnand %p693_p9, %p687_p6 }
  0x76   :  { %536 = vmatprep.subr.bf16.mxu0 %v535_v16 }
  0x77   :  { %534 = vmatpush3.bf16.msra.mxu1 %v531_v14 }
  0x78   :  { %495 = vmatmul.mubr.msk.f32.vlgmr.msra.gmra.mrb[0].mxu0 %vm132_vm0, %v120_v19 }
  0x79   :  { %538 = vmatpush3.bf16.msra.mxu0 %v535_v16  ;;  %516 = vmatprep.mubr.msk.f32.mxu0 %vm132_vm0, %v312_v22 }
  0x7a   :  { %506 = vmatmul.mubr.msk.f32.vlgmr.msra.gmra.mrb[0].mxu1 %vm132_vm0, %v217_v21  ;;  %540 = vmatprep.subr.bf16.mxu0 %v539_v20 }
  0x7d   :  { %542 = vmatpush3.bf16.msra.mxu0 %v539_v20 }
  0x80   :  { %517 = vmatmul.mubr.msk.f32.vlgmr.msra.gmra.mrb[2].mxu0 %vm132_vm0, %v313_v23 }
 0x14b   :  { %v496_v26 = vpop.f32.mrb[0].mxu0 }
 0x14c   :  { %v211_v27 = vadd.f32 %v496_v26, %v459_v24  ;;  %v205_v28 = vpop.f32.mrb[1].mxu0 }
 0x14d   :  { %v507_v29 = vpop.f32.mrb[0].mxu1  ;;  %v206_v30 = vadd.f32 %v459_v24, %v205_v28 }
 0x14e   :  { %v307_v31 = vadd.f32 %v507_v29, %v462_v25  ;;  %v301_v32 = vpop.f32.mrb[1].mxu1  ;;  %215 = vst.msk [vmem:[#allocation13 + $0x8] sm:$0xff] %vm132_vm0, %v211_v27 }
 0x14f   :  { %v302_v33 = vadd.f32 %v462_v25, %v301_v32  ;;  %214 = vst.msk [vmem:[#allocation13] sm:$0xff] %vm132_vm0, %v206_v30 }
 0x150   :  { %311 = vst.msk [vmem:[#allocation14 + $0x8] sm:$0xff] %vm132_vm0, %v307_v31 }
 0x151   :  { %310 = vst.msk [vmem:[#allocation14] sm:$0xff] %vm132_vm0, %v302_v33 }
 0x152   :  { %697 = shalt.err (!%p694_p10)
}
 0x153   :  { %s698_s27 = scalar_lea.hbm %s1028_s9, 256 }
 0x154   :  { %p699_p11 = scmp.ne.s32.totalorder %s1028_s9, %s698_s27  ;;  %p702_p12 = scmp.lt.u32.totalorder %s698_s27, %s1028_s9 }
 0x156   :  { %p704_p13 = pnand %p702_p12, %p699_p11 }
 0x158   :  { %707 = shalt.err (!%p704_p13)
}
 0x159   :  { %419 = dma.vmem_to_hbm [thread:$0]  %s414_s3, 256, %s1028_s9, [#allocation4], %s766_s29, %s766_s29, %s767_s30  }
 0x15a   :  { %s708_s28 = scalar_lea.vmem %s959_s19, 256  ;;  %p713_p1 = scmp.lt.s32.totalorder %s959_s19, %s959_s19 }
 0x15b   :  { %p709_p0 = scmp.ne.s32.totalorder %s959_s19, %s708_s28  ;;  %p714_p2 = scmp.lt.s32.totalorder %s708_s28, %s708_s28 }
 0x15d   :  { %p715_p3 = por %p714_p2, %p713_p1 }
 0x15f   :  { %p716_p4 = pnand %p715_p3, %p709_p0 }
 0x161   :  { %719 = shalt.err (!%p716_p4)
}
 0x162   :  { %s720_s12 = scalar_lea.hbm %s1029_s10, 256 }
 0x163   :  { %p721_p5 = scmp.ne.s32.totalorder %s1029_s10, %s720_s12  ;;  %p724_p6 = scmp.lt.u32.totalorder %s720_s12, %s1029_s10 }
 0x165   :  { %p726_p7 = pnand %p724_p6, %p721_p5 }
 0x167   :  { %729 = shalt.err (!%p726_p7)
}
 0x168   :  { %431 = dma.vmem_to_hbm [thread:$0]  %s959_s19, 256, %s1029_s10, [#allocation15], %s766_s29, %s766_s29, %s767_s30   ;;  %v518_v35 = vpop.f32.mrb[2].mxu0 }
 0x169   :  { %s774_s16 = smov [#allocation16]   ;;  %v403_v36 = vadd.f32 %v518_v35, %v465_v34  ;;  %v397_v37 = vpop.f32.mrb[3].mxu0 }
 0x16a   :  { %s437_s17 = sshll.u32 %s774_s16, 4  ;;  %v398_v38 = vadd.f32 %v465_v34, %v397_v37  ;;  %s438_s17 = int_to_ptr.vmem [resolvable:$true] %s437_s17 }
 0x16b   :  { %407 = vst.msk [vmem:[#allocation16 + $0x8] sm:$0xff] %vm132_vm0, %v403_v36  ;;  %s730_s3 = scalar_lea.vmem %s438_s17, 256  ;;  %p735_p9 = scmp.lt.s32.totalorder %s438_s17, %s438_s17 }
 0x16c   :  { %406 = vst.msk [vmem:[#allocation16] sm:$0xff] %vm132_vm0, %v398_v38  ;;  %p731_p8 = scmp.ne.s32.totalorder %s438_s17, %s730_s3  ;;  %p736_p10 = scmp.lt.s32.totalorder %s730_s3, %s730_s3 }
 0x16e   :  { %p737_p11 = por %p736_p10, %p735_p9 }
 0x170   :  { %p738_p12 = pnand %p737_p11, %p731_p8 }
 0x172   :  { %741 = shalt.err (!%p738_p12)
}
 0x173   :  { %s742_s19 = scalar_lea.hbm %s1030_s11, 256 }
 0x174   :  { %p743_p13 = scmp.ne.s32.totalorder %s1030_s11, %s742_s19  ;;  %p746_p0 = scmp.lt.u32.totalorder %s742_s19, %s1030_s11 }
 0x176   :  { %p748_p1 = pnand %p746_p0, %p743_p13 }
 0x178   :  { %751 = shalt.err (!%p748_p1)
}
 0x179   :  { %443 = dma.vmem_to_hbm [thread:$0]  %s438_s17, 256, %s1030_s11, [#allocation15], %s766_s29, %s766_s29, %s767_s30  }
 0x17a   :  { %760 = dma.done.wait [#allocation4], 256  }
 0x17b   :  { %761 = vsyncadd [#allocation4], 4294967040 }
 0x17c   :  { %762 = dma.done.wait [#allocation15], 512  }
 0x17d   :  { %763 = vsyncadd [#allocation15], 4294966784 }
 0x17e   :  { %453 = vsyncpa [#allocation3], 1 }
 0x17f   :  { %454 = vsyncpa [#allocation6], 1 }
 0x180   :  { %455 = vsyncpa [#allocation9], 1 }
 0x181   :  { %456 = vsyncpa [#allocation12], 1 }
 0x182   :  { %457 = vsyncpa [#allocation4], 1 }
 0x183   :  { %458 = vsyncpa [#allocation15], 1 }

</bundles_post_ra>
